<compile_context>
chip_gen: v7x
topology: tpu7x:2x2x1
jax: 0.10.0
libtpu: 0.0.40
codegen_flags: <defaults>
</compile_context>

<pallas_src>
import functools

import jax
import jax.numpy as jnp
from jax.experimental import pallas as pl
from jax.experimental.pallas import tpu as pltpu


# ----------------------------------------------------------------------------
# helpers
# ----------------------------------------------------------------------------

def _tile(dim, target, align):
    """Largest tile <= target that divides `dim` and is `align`-aligned,
    falling back to the full dimension (always legal for BlockSpec)."""
    if dim <= target:
        return dim
    t = (target // align) * align
    while t >= align:
        if dim % t == 0:
            return t
        t -= align
    return dim


# ----------------------------------------------------------------------------
# matmul kernels (projections)
# ----------------------------------------------------------------------------

def _matmul_kernel_f32(x_ref, w_ref, o_ref):
    # f32 output: accumulate directly into the resident output block.
    @pl.when(pl.program_id(2) == 0)
    def _():
        o_ref[...] = jnp.zeros_like(o_ref)

    o_ref[...] += jnp.dot(x_ref[...], w_ref[...],
                          preferred_element_type=jnp.float32)


def _matmul_bias_kernel_f32(x_ref, w_ref, b_ref, o_ref):
    @pl.when(pl.program_id(2) == 0)
    def _():
        o_ref[...] = jnp.zeros_like(o_ref)

    o_ref[...] += jnp.dot(x_ref[...], w_ref[...],
                          preferred_element_type=jnp.float32)

    @pl.when(pl.program_id(2) == pl.num_programs(2) - 1)
    def _():
        o_ref[...] = o_ref[...] + b_ref[...].astype(jnp.float32)


def _matmul_kernel(x_ref, w_ref, o_ref, acc_ref):
    # non-f32 output: keep an f32 accumulator scratch
    @pl.when(pl.program_id(2) == 0)
    def _():
        acc_ref[...] = jnp.zeros_like(acc_ref)

    acc_ref[...] += jnp.dot(x_ref[...], w_ref[...],
                            preferred_element_type=jnp.float32)

    @pl.when(pl.program_id(2) == pl.num_programs(2) - 1)
    def _():
        o_ref[...] = acc_ref[...].astype(o_ref.dtype)


def _matmul_bias_kernel(x_ref, w_ref, b_ref, o_ref, acc_ref):
    @pl.when(pl.program_id(2) == 0)
    def _():
        acc_ref[...] = jnp.zeros_like(acc_ref)

    acc_ref[...] += jnp.dot(x_ref[...], w_ref[...],
                            preferred_element_type=jnp.float32)

    @pl.when(pl.program_id(2) == pl.num_programs(2) - 1)
    def _():
        o_ref[...] = (acc_ref[...] + b_ref[...].astype(jnp.float32)
                      ).astype(o_ref.dtype)


def pallas_linear(x2d, w, b=None, *, tm=512, tn=512, tk=512):
    """y = x2d @ w (+ b). Tiled, pipelined, f32 accumulation on the MXU."""
    M, K = x2d.shape
    K2, N = w.shape
    assert K == K2
    tm = _tile(M, tm, 8)
    tn = _tile(N, tn, 128)
    tk = _tile(K, tk, 128)
    grid = (M // tm, N // tn, K // tk)
    cparams = pltpu.CompilerParams(
        dimension_semantics=("parallel", "parallel", "arbitrary"))
    cost = pl.CostEstimate(
        flops=2 * M * N * K, transcendentals=0,
        bytes_accessed=(x2d.dtype.itemsize * M * K + w.dtype.itemsize * K * N
                        + x2d.dtype.itemsize * M * N))

    x_spec = pl.BlockSpec((tm, tk), lambda i, j, k: (i, k))
    w_spec = pl.BlockSpec((tk, tn), lambda i, j, k: (k, j))
    o_spec = pl.BlockSpec((tm, tn), lambda i, j, k: (i, j))
    out_shape = jax.ShapeDtypeStruct((M, N), x2d.dtype)
    out_is_f32 = x2d.dtype == jnp.float32

    if b is None:
        if out_is_f32:
            kern, in_specs, scratch, args = _matmul_kernel_f32, [x_spec, w_spec], [], (x2d, w)
        else:
            kern, in_specs, scratch, args = (_matmul_kernel, [x_spec, w_spec],
                                             [pltpu.VMEM((tm, tn), jnp.float32)], (x2d, w))
    else:
        b2 = b.reshape(1, N).astype(x2d.dtype)
        b_spec = pl.BlockSpec((1, tn), lambda i, j, k: (0, j))
        if out_is_f32:
            kern, in_specs, scratch, args = (_matmul_bias_kernel_f32,
                                             [x_spec, w_spec, b_spec], [], (x2d, w, b2))
        else:
            kern, in_specs, scratch, args = (_matmul_bias_kernel,
                                             [x_spec, w_spec, b_spec],
                                             [pltpu.VMEM((tm, tn), jnp.float32)], (x2d, w, b2))

    return pl.pallas_call(
        kern, out_shape=out_shape, grid=grid,
        in_specs=in_specs, out_specs=o_spec, scratch_shapes=scratch,
        compiler_params=cparams, cost_estimate=cost,
    )(*args)


# ----------------------------------------------------------------------------
# fused RoPE + QKV head split (keeps (B, S, heads, D) layout -> no transposes)
# ----------------------------------------------------------------------------

def _rope_split_kernel(qkv_ref, cos_ref, sin_ref, q_ref, k_ref, v_ref, *,
                       num_heads, num_kv, scale):
    qkv = qkv_ref[...]                                   # (ts, NH+2KV, D), native dtype
    cos = cos_ref[...].astype(jnp.float32)[:, None, :]   # (ts, 1, D)
    sin = sin_ref[...].astype(jnp.float32)[:, None, :]

    def rope(x):  # x: (ts, nh, D) f32
        d = x.shape[-1]
        if d % 256 == 0:
            # lane-aligned halves -> XLU roll + sign (free slot next to the VPU FMAs)
            sign = jnp.where(
                jax.lax.broadcasted_iota(jnp.int32, x.shape, 2) < d // 2, -1.0, 1.0)
            rot = pltpu.roll(x, shift=d // 2, axis=-1) * sign
        else:
            rot = jnp.concatenate([-x[..., d // 2:], x[..., : d // 2]], axis=-1)
        return x * cos + rot * sin

    q = qkv[:, :num_heads, :].astype(jnp.float32)
    k = qkv[:, num_heads:num_heads + num_kv, :].astype(jnp.float32)
    v = qkv[:, num_heads + num_kv:, :]

    # softmax scale folded into Q once (saves a tq x tkv multiply per kv step).
    q_ref[...] = (rope(q) * scale).astype(q_ref.dtype)
    k_ref[...] = rope(k).astype(k_ref.dtype)
    v_ref[...] = v


def pallas_rope_split(qkv4, cos, sin, num_heads, num_kv, scale, *, ts=512):
    """qkv4: (B, S, NH+2KV, D); cos/sin: (B, S, D) -> q,k,v in (B,S,heads,D)."""
    B, S, NHT, D = qkv4.shape
    ts = _tile(S, ts, 8)
    kern = functools.partial(_rope_split_kernel, num_heads=num_heads,
                             num_kv=num_kv, scale=scale)
    return pl.pallas_call(
        kern,
        out_shape=(jax.ShapeDtypeStruct((B, S, num_heads, D), qkv4.dtype),
                   jax.ShapeDtypeStruct((B, S, num_kv, D), qkv4.dtype),
                   jax.ShapeDtypeStruct((B, S, num_kv, D), qkv4.dtype)),
        grid=(B, S // ts),
        in_specs=[
            pl.BlockSpec((None, ts, NHT, D), lambda b, si: (b, si, 0, 0)),
            pl.BlockSpec((None, ts, D), lambda b, si: (b, si, 0)),
            pl.BlockSpec((None, ts, D), lambda b, si: (b, si, 0)),
        ],
        out_specs=(
            pl.BlockSpec((None, ts, num_heads, D), lambda b, si: (b, si, 0, 0)),
            pl.BlockSpec((None, ts, num_kv, D), lambda b, si: (b, si, 0, 0)),
            pl.BlockSpec((None, ts, num_kv, D), lambda b, si: (b, si, 0, 0)),
        ),
        compiler_params=pltpu.CompilerParams(
            dimension_semantics=("parallel", "parallel")),
    )(qkv4, cos, sin)


# ----------------------------------------------------------------------------
# flash attention (all heads inside the kernel -> GQA K/V + mask reuse)
# ----------------------------------------------------------------------------

def _flash_attn_kernel(q_ref, k_ref, v_ref, mask_ref, o_ref, lse_ref,
                       m_sc, l_sc, acc_sc, *, num_heads, groups, causal, tq, tkv):
    qi = pl.program_id(1)
    ki = pl.program_id(2)

    @pl.when(ki == 0)
    def _():
        m_sc[...] = jnp.full_like(m_sc, -jnp.inf)
        l_sc[...] = jnp.zeros_like(l_sc)
        acc_sc[...] = jnp.zeros_like(acc_sc)

    def compute():
        mask = mask_ref[...].astype(jnp.float32)   # (tq, tkv), shared by all heads
        q_all = q_ref[...]                         # (tq, NH, D), native dtype, pre-scaled
        k_all = k_ref[...]                         # (tkv, NKV, D)
        v_all = v_ref[...]
        for h in range(num_heads):                 # static unroll; shared K/V tile
            q_h = q_all[:, h, :]
            k_h = k_all[:, h // groups, :]
            v_h = v_all[:, h // groups, :]
            # native-dtype MXU matmul, f32 accumulation
            s = jax.lax.dot_general(q_h, k_h, (((1,), (1,)), ((), ())),
                                    preferred_element_type=jnp.float32)
            s = s + mask
            m_prev = m_sc[h]
            m_new = jnp.maximum(m_prev, jnp.max(s, axis=-1, keepdims=True))
            alpha = jnp.exp(m_prev - m_new)
            p = jnp.exp(s - m_new)
            l_sc[h] = alpha * l_sc[h] + jnp.sum(p, axis=-1, keepdims=True)
            acc_sc[h] = alpha * acc_sc[h] + jnp.dot(
                p.astype(v_h.dtype), v_h, preferred_element_type=jnp.float32)
            m_sc[h] = m_new

    if causal:
        @pl.when(ki * tkv <= qi * tq + (tq - 1))   # skip fully-masked kv tiles
        def _():
            compute()
    else:
        compute()

    @pl.when(ki == pl.num_programs(2) - 1)
    def _():
        for h in range(num_heads):
            l_h = l_sc[h]
            m_h = m_sc[h]
            inv_l = pl.reciprocal(l_h, approx=True)            # EUP, ~free
            o_ref[:, h, :] = (acc_sc[h] * inv_l).astype(o_ref.dtype)
            lse_ref[h] = (m_h + jnp.log(l_h))[:, 0]            # lane-dense store


def pallas_flash_attention(q, k, v, mask, *, causal=False, tq=256, tkv=256):
    """q: (B,S,NH,D); k/v: (B,S,NKV,D); mask: (B,1,S,S) additive.
    Returns (out (B,S,NH,D), lse (B,NH,S)). Q must already carry the softmax scale."""
    B, S, NH, D = q.shape
    NKV = k.shape[2]
    assert NH % NKV == 0
    groups = NH // NKV
    tq = _tile(S, tq, 8)
    tkv = _tile(S, tkv, 128)
    grid = (B, S // tq, S // tkv)
    kern = functools.partial(_flash_attn_kernel, num_heads=NH, groups=groups,
                             causal=causal, tq=tq, tkv=tkv)
    out, lse = pl.pallas_call(
        kern,
        out_shape=(jax.ShapeDtypeStruct((B, S, NH, D), q.dtype),
                   jax.ShapeDtypeStruct((B, NH, S), jnp.float32)),
        grid=grid,
        in_specs=[
            pl.BlockSpec((None, tq, NH, D), lambda b, qi, ki: (b, qi, 0, 0)),
            pl.BlockSpec((None, tkv, NKV, D), lambda b, qi, ki: (b, ki, 0, 0)),
            pl.BlockSpec((None, tkv, NKV, D), lambda b, qi, ki: (b, ki, 0, 0)),
            pl.BlockSpec((None, None, tq, tkv), lambda b, qi, ki: (b, 0, qi, ki)),
        ],
        out_specs=(
            pl.BlockSpec((None, tq, NH, D), lambda b, qi, ki: (b, qi, 0, 0)),
            pl.BlockSpec((None, NH, tq), lambda b, qi, ki: (b, 0, qi)),
        ),
        scratch_shapes=[
            pltpu.VMEM((NH, tq, 1), jnp.float32),   # running max m
            pltpu.VMEM((NH, tq, 1), jnp.float32),   # running sum l
            pltpu.VMEM((NH, tq, D), jnp.float32),   # output accumulator
        ],
        compiler_params=pltpu.CompilerParams(
            dimension_semantics=("parallel", "parallel", "arbitrary")),
    )(q, k, v, mask)
    return out, lse


# ----------------------------------------------------------------------------
# attention weights reconstruction (module output #2) from the flash LSE
# ----------------------------------------------------------------------------

def _attn_weights_kernel(q_ref, k_ref, mask_ref, lse_ref, w_ref, *,
                         num_heads, groups, causal, tq, tkv):
    qi = pl.program_id(1)
    ki = pl.program_id(2)

    def compute():
        mask = mask_ref[...].astype(jnp.float32)
        q_all = q_ref[...]
        k_all = k_ref[...]
        for h in range(num_heads):
            s = jax.lax.dot_general(q_all[:, h, :], k_all[:, h // groups, :],
                                    (((1,), (1,)), ((), ())),
                                    preferred_element_type=jnp.float32)
            s = s + mask
            lse_h = lse_ref[h][:, None]
            w_ref[h] = jnp.exp(s - lse_h).astype(w_ref.dtype)

    if causal:
        live = ki * tkv <= qi * tq + (tq - 1)

        @pl.when(live)
        def _():
            compute()

        @pl.when(jnp.logical_not(live))
        def _():
            # fully masked tile: softmax weight underflows to exactly 0 in f32
            w_ref[...] = jnp.zeros_like(w_ref)
    else:
        compute()


def pallas_attention_weights(q, k, mask, lse, *, causal=False, tq=256, tkv=256):
    B, S, NH, D = q.shape
    NKV = k.shape[2]
    groups = NH // NKV
    tq = _tile(S, tq, 8)
    tkv = _tile(S, tkv, 128)
    kern = functools.partial(_attn_weights_kernel, num_heads=NH, groups=groups,
                             causal=causal, tq=tq, tkv=tkv)
    return pl.pallas_call(
        kern,
        out_shape=jax.ShapeDtypeStruct((B, NH, S, S), q.dtype),
        grid=(B, S // tq, S // tkv),
        in_specs=[
            pl.BlockSpec((None, tq, NH, D), lambda b, qi, ki: (b, qi, 0, 0)),
            pl.BlockSpec((None, tkv, NKV, D), lambda b, qi, ki: (b, ki, 0, 0)),
            pl.BlockSpec((None, None, tq, tkv), lambda b, qi, ki: (b, 0, qi, ki)),
            pl.BlockSpec((None, NH, tq), lambda b, qi, ki: (b, 0, qi)),
        ],
        out_specs=pl.BlockSpec((None, NH, tq, tkv),
                               lambda b, qi, ki: (b, 0, qi, ki)),
        compiler_params=pltpu.CompilerParams(
            dimension_semantics=("parallel", "parallel", "parallel")),
    )(q, k, mask, lse)


# ----------------------------------------------------------------------------
# GemmaAttention module (glue in plain JAX; compute in the kernels above)
# ----------------------------------------------------------------------------

class GemmaConfig:
    def __init__(self, vocab_size, hidden_size, intermediate_size,
                 num_hidden_layers, num_attention_heads, num_key_value_heads,
                 head_dim=256, max_position_embeddings=8192, rms_norm_eps=1e-6,
                 rope_theta=10000.0, attention_bias=False, attention_dropout=0.0,
                 pad_token_id=None, **kwargs):
        self.vocab_size = vocab_size
        self.max_position_embeddings = max_position_embeddings
        self.hidden_size = hidden_size
        self.intermediate_size = intermediate_size
        self.num_hidden_layers = num_hidden_layers
        self.num_attention_heads = num_attention_heads
        self.head_dim = head_dim
        self.num_key_value_heads = num_key_value_heads
        self.rms_norm_eps = rms_norm_eps
        self.rope_theta = rope_theta
        self.attention_bias = attention_bias
        self.attention_dropout = attention_dropout
        self.pad_token_id = pad_token_id


def rope_cos_sin(position_ids, head_dim, base, dtype):
    # position_ids: (B, S) -> cos/sin: (B, S, head_dim)
    inv_freq = 1.0 / (base ** (jnp.arange(0, head_dim, 2, dtype=jnp.float32)
                               / head_dim))
    freqs = position_ids.astype(jnp.float32)[:, :, None] * inv_freq[None, None, :]
    emb = jnp.concatenate([freqs, freqs], axis=-1)
    return jnp.cos(emb).astype(dtype), jnp.sin(emb).astype(dtype)


def prepare_params(params):
    """One-time param prep: fuse the QKV weight so the forward never concats."""
    p = dict(params)
    p["qkv_w"] = jnp.concatenate(
        [params["q_w"], params["k_w"], params["v_w"]], axis=1)
    return p


def gemma_attention_forward(params, cfg, hidden_states, attention_mask,
                            position_ids, *, causal_mask_hint=False,
                            attn_tq=256, attn_tkv=256):
    """Mirrors GemmaAttention.forward (kv_cache=None). Returns (out, weights).

    `causal_mask_hint=True` is a pure-performance hint that `attention_mask`
    is a standard causal additive mask (enables kv-tile skipping)."""
    B, S, H = hidden_states.shape
    NH, NKV, D = cfg.num_attention_heads, cfg.num_key_value_heads, cfg.head_dim
    NHT = NH + 2 * NKV
    scale = D ** (-0.5)

    x2d = hidden_states.reshape(B * S, H)

    # Fused QKV projection (weight pre-fused once in prepare_params).
    qkv = pallas_linear(x2d, params["qkv_w"])          # (B*S, NHT*D)
    qkv4 = qkv.reshape(B, S, NHT, D)                   # free view

    # RoPE + head split in one pass; Q pre-scaled; no layout transposes.
    cos, sin = rope_cos_sin(position_ids, D, cfg.rope_theta, hidden_states.dtype)
    q, k, v = pallas_rope_split(qkv4, cos, sin, NH, NKV, scale)

    # Flash-style attention (online softmax) + exact weights reconstruction.
    attn_out, lse = pallas_flash_attention(q, k, v, attention_mask,
                                           causal=causal_mask_hint,
                                           tq=attn_tq, tkv=attn_tkv)
    attn_weights = pallas_attention_weights(q, k, attention_mask, lse,
                                            causal=causal_mask_hint,
                                            tq=attn_tq, tkv=attn_tkv)
    # TODO(synk): attention dropout (p=cfg.attention_dropout) not implemented
    # (p=0.0 in this config); kv_cache update path not implemented (kv_cache=None).

    out2d = attn_out.reshape(B * S, NH * D)            # free view (B,S,NH,D)
    out = pallas_linear(out2d, params["o_w"]).reshape(B, S, H)
    return out, attn_weights


# ----------------------------------------------------------------------------
# pure-JAX reference (for correctness check only)
# ----------------------------------------------------------------------------

def reference_attention(params, cfg, hidden, mask, position_ids):
    B, S, H = hidden.shape
    NH, NKV, D = cfg.num_attention_heads, cfg.num_key_value_heads, cfg.head_dim
    x2d = hidden.reshape(B * S, H)
    q = (x2d @ params["q_w"]).reshape(B, S, NH, D).transpose(0, 2, 1, 3)
    k = (x2d @ params["k_w"]).reshape(B, S, NKV, D).transpose(0, 2, 1, 3)
    v = (x2d @ params["v_w"]).reshape(B, S, NKV, D).transpose(0, 2, 1, 3)

    cos, sin = rope_cos_sin(position_ids, D, cfg.rope_theta, hidden.dtype)

    def rot_half(x):
        return jnp.concatenate([-x[..., D // 2:], x[..., : D // 2]], axis=-1)

    c, s = cos[:, None], sin[:, None]
    q = q * c + rot_half(q) * s
    k = k * c + rot_half(k) * s

    groups = NH // NKV
    k = jnp.repeat(k, groups, axis=1)
    v = jnp.repeat(v, groups, axis=1)

    scores = jnp.einsum("bhqd,bhkd->bhqk", q, k) * (D ** -0.5) + mask
    w = jax.nn.softmax(scores, axis=-1)
    out = jnp.einsum("bhqk,bhkd->bhqd", w, v)
    out = out.transpose(0, 2, 1, 3).reshape(B, S, NH * D) @ params["o_w"]
    return out, w


# ----------------------------------------------------------------------------
# main
# ----------------------------------------------------------------------------

if __name__ == "__main__":
    cfg = GemmaConfig(vocab_size=128, hidden_size=64, intermediate_size=128,
                      num_hidden_layers=1, num_attention_heads=2,
                      num_key_value_heads=1, head_dim=32,
                      max_position_embeddings=512)
    B, S = 2, 256
    H, NH, NKV, D = (cfg.hidden_size, cfg.num_attention_heads,
                     cfg.num_key_value_heads, cfg.head_dim)

    key = jax.random.PRNGKey(0)
    k1, k2, k3, k4, k5 = jax.random.split(key, 5)
    params = {
        "q_w": 0.05 * jax.random.normal(k1, (H, NH * D), jnp.float32),
        "k_w": 0.05 * jax.random.normal(k2, (H, NKV * D), jnp.float32),
        "v_w": 0.05 * jax.random.normal(k3, (H, NKV * D), jnp.float32),
        "o_w": 0.05 * jax.random.normal(k4, (NH * D, H), jnp.float32),
    }
    fused_params = prepare_params(params)   # QKV concat hoisted out of forward

    hidden = jax.random.normal(k5, (B, S, H), jnp.float32)
    position_ids = jnp.broadcast_to(jnp.arange(S, dtype=jnp.int32)[None, :], (B, S))

    # causal additive mask (as the module expects attention_mask as input)
    causal = jnp.tril(jnp.ones((S, S), jnp.float32))
    attention_mask = jnp.where(causal == 1.0, 0.0, -1e9)[None, None, :, :]
    attention_mask = jnp.broadcast_to(attention_mask, (B, 1, S, S))

    # 128-wide attention tiles so the causal kv-tile-skip path is exercised.
    out, weights = gemma_attention_forward(fused_params, cfg, hidden,
                                           attention_mask, position_ids,
                                           causal_mask_hint=True,
                                           attn_tq=128, attn_tkv=128)
    out = jax.block_until_ready(out)
    weights = jax.block_until_ready(weights)

    ref_out, ref_w = reference_attention(params, cfg, hidden, attention_mask,
                                         position_ids)

    assert out.shape == (B, S, H)
    assert weights.shape == (B, NH, S, S)
    assert bool(jnp.all(jnp.isfinite(out)))
    assert bool(jnp.all(jnp.isfinite(weights)))
    assert bool(jnp.allclose(out, ref_out, atol=1e-2, rtol=1e-2)), "output mismatch"
    assert bool(jnp.allclose(weights, ref_w, atol=1e-2, rtol=1e-2)), "weights mismatch"
    print("KERNEL_OK")
</pallas_src>

<mosaic_0001>
module attributes {stable_mosaic.version = 11 : i64} {
  func.func @_matmul_kernel_f32(%arg0: i32, %arg1: i32, %arg2: i32, %arg3: memref<512x64xf32, #tpu.memory_space<vmem>>, %arg4: memref<64x128xf32, #tpu.memory_space<vmem>>, %arg5: memref<512x128xf32, #tpu.memory_space<vmem>>) attributes {dimension_semantics = [#tpu.dimension_semantics<parallel>, #tpu.dimension_semantics<parallel>, #tpu.dimension_semantics<arbitrary>], iteration_bounds = array<i64: 1, 1, 1>, scalar_prefetch = 0 : i64, scratch_operands = 0 : i64, tpu.core_type = #tpu.core_type<tc>, window_params = [{transform_indices = @transform_0, window_bounds = array<i64: 512, 64>}, {transform_indices = @transform_1, window_bounds = array<i64: 64, 128>}, {transform_indices = @transform_2, window_bounds = array<i64: 512, 128>}]} {
    %c0_i32 = arith.constant 0 : i32
    %0 = arith.cmpi eq, %arg2, %c0_i32 : i32
    %1 = arith.extui %0 : i1 to i32
    %c0_i32_0 = arith.constant 0 : i32
    %2 = arith.cmpi ne, %1, %c0_i32_0 : i32
    scf.if %2 {
      %cst_8 = arith.constant 0.000000e+00 : f32
      %9 = vector.broadcast %cst_8 : f32 to vector<512x128xf32>
      %c0_9 = arith.constant 0 : index
      %c0_10 = arith.constant 0 : index
      %10 = vector.load %arg5[%c0_9, %c0_10] : memref<512x128xf32, #tpu.memory_space<vmem>>, vector<512x128xf32>
      tpu.vector_store %arg5[%c0_9, %c0_10], %9 {strides = array<i32>} : memref<512x128xf32, #tpu.memory_space<vmem>>, vector<512x128xf32>,
    } else {
    }
    %c0 = arith.constant 0 : index
    %c0_1 = arith.constant 0 : index
    %3 = vector.load %arg5[%c0, %c0_1] : memref<512x128xf32, #tpu.memory_space<vmem>>, vector<512x128xf32>
    %c0_2 = arith.constant 0 : index
    %c0_3 = arith.constant 0 : index
    %4 = vector.load %arg3[%c0_2, %c0_3] : memref<512x64xf32, #tpu.memory_space<vmem>>, vector<512x64xf32>
    %c0_4 = arith.constant 0 : index
    %c0_5 = arith.constant 0 : index
    %5 = vector.load %arg4[%c0_4, %c0_5] : memref<64x128xf32, #tpu.memory_space<vmem>>, vector<64x128xf32>
    %cst = arith.constant dense<0.000000e+00> : vector<512x128xf32>
    %6 = tpu.matmul %4, %5, %cst {dimension_numbers = #tpu.dot_dimension_numbers<[1], [0], [0], [1], [0, 0, 1, 1], [], []>} : vector<512x64xf32>, vector<64x128xf32>, vector<512x128xf32> -> vector<512x128xf32>
    %7 = arith.addf %3, %6 : vector<512x128xf32>
    %c0_6 = arith.constant 0 : index
    %c0_7 = arith.constant 0 : index
    %8 = vector.load %arg5[%c0_6, %c0_7] : memref<512x128xf32, #tpu.memory_space<vmem>>, vector<512x128xf32>
    tpu.vector_store %arg5[%c0_6, %c0_7], %7 {strides = array<i32>} : memref<512x128xf32, #tpu.memory_space<vmem>>, vector<512x128xf32>,
    return
  }
  func.func @transform_0(%arg0: i32, %arg1: i32, %arg2: i32) -> (i32, i32) {
    %c0_i32 = arith.constant 0 : i32
    return %arg0, %arg2 : i32, i32
  }
  func.func @transform_1(%arg0: i32, %arg1: i32, %arg2: i32) -> (i32, i32) {
    %c0_i32 = arith.constant 0 : i32
    return %arg2, %arg1 : i32, i32
  }
  func.func @transform_2(%arg0: i32, %arg1: i32, %arg2: i32) -> (i32, i32) {
    %c0_i32 = arith.constant 0 : i32
    return %arg0, %arg1 : i32, i32
  }
}

</mosaic_0001>

<bundles_post_ra>
// kernel: tpu_custom_call.1
= control target key start
LH: loop header
LB: loop body
LE: loop exit
PB: predicated region body
PF: predicated region fallthrough
CT: control target
= control target key end

     0   :  { %vm216_vm0 = vcmask 523264   ;;  %s1548_s0 = inlined_call_operand.vmem [shape: f32[512,64], index: 0, kind: input, shape index: {}]   ;;  %s1549_s1 = inlined_call_operand.vmem [shape: f32[64,128], index: 1, kind: input, shape index: {}]   ;;  %s1550_s2 = inlined_call_operand.hbm [shape: f32[512,128], index: 2, kind: output, shape index: {}]  }
   0x1   :  { %v208_v0 = vld [vmem:[%s1549_s1] sm:$0xff]  ;;  %v209_v1 = vld [vmem:[%s1549_s1 + $0x8] sm:$0xff]  ;;  %v210_v2 = vld [vmem:[%s1549_s1 + $0x10] sm:$0xff] }
   0x2   :  { %v1186_v3 = vpack.c.bf16 %v209_v1, %v208_v0  ;;  %v211_v4 = vld [vmem:[%s1549_s1 + $0x18] sm:$0xff]  ;;  %v212_v6 = vld [vmem:[%s1549_s1 + $0x20] sm:$0xff]  ;;  %v213_v7 = vld [vmem:[%s1549_s1 + $0x28] sm:$0xff] }
   0x3   :  { %v1190_v5 = vpack.c.bf16 %v211_v4, %v210_v2  ;;  %v144_v8 = vld [vmem:[%s1548_s0] sm:$0xff]  ;;  %v1194_v10 = vpack.c.bf16 %v213_v7, %v212_v6  ;;  %v214_v11 = vld [vmem:[%s1549_s1 + $0x30] sm:$0xff]  ;;  %v215_v12 = vld [vmem:[%s1549_s1 + $0x38] sm:$0xff] }
   0x4   :  { %1187 = vmatprep.subr.bf16.mxu0 %v1186_v3  ;;  %1202 = vmatprep.subr.bf16.mxu1 %v1186_v3  ;;  %v176_v9 = vld [vmem:[%s1548_s0 + $0x100] sm:$0xff]  ;;  %v1198_v13 = vpack.c.bf16 %v215_v12, %v214_v11  ;;  %v145_v14 = vld [vmem:[%s1548_s0 + $0x8] sm:$0xff]  ;;  %v146_v16 = vld [vmem:[%s1548_s0 + $0x10] sm:$0xff] }
   0x5   :  { %1189 = vmatpush3.bf16.msra.mxu0 %v1186_v3  ;;  %1206 = vmatpush3.bf16.msra.mxu1 %v1186_v3  ;;  %v177_v15 = vld [vmem:[%s1548_s0 + $0x108] sm:$0xff]  ;;  %v178_v17 = vld [vmem:[%s1548_s0 + $0x110] sm:$0xff]  ;;  %v147_v18 = vld [vmem:[%s1548_s0 + $0x18] sm:$0xff] }
   0x6   :  { %1191 = vmatprep.subr.bf16.mxu0 %v1190_v5  ;;  %1203 = vmatprep.subr.bf16.mxu1 %v1190_v5  ;;  %v179_v19 = vld [vmem:[%s1548_s0 + $0x118] sm:$0xff]  ;;  %v148_v20 = vld [vmem:[%s1548_s0 + $0x20] sm:$0xff]  ;;  %v149_v22 = vld [vmem:[%s1548_s0 + $0x28] sm:$0xff] }
   0x7   :  { %1090 = vmatprep.mubr.msk.f32.mxu0 %vm216_vm0, %v144_v8  ;;  %1138 = vmatprep.mubr.msk.f32.mxu1 %vm216_vm0, %v176_v9  ;;  %v180_v21 = vld [vmem:[%s1548_s0 + $0x120] sm:$0xff]  ;;  %v181_v23 = vld [vmem:[%s1548_s0 + $0x128] sm:$0xff] }
   0x9   :  { %1193 = vmatpush3.bf16.msra.mxu0 %v1190_v5  ;;  %1207 = vmatpush3.bf16.msra.mxu1 %v1190_v5 }
   0xa   :  { %1195 = vmatprep.subr.bf16.mxu0 %v1194_v10  ;;  %1204 = vmatprep.subr.bf16.mxu1 %v1194_v10 }
   0xd   :  { %1197 = vmatpush3.bf16.msra.mxu0 %v1194_v10  ;;  %1208 = vmatpush3.bf16.msra.mxu1 %v1194_v10 }
   0xe   :  { %1199 = vmatprep.subr.bf16.mxu0 %v1198_v13  ;;  %1205 = vmatprep.subr.bf16.mxu1 %v1198_v13 }
  0x11   :  { %1201 = vmatpush3.bf16.msra.mxu0 %v1198_v13  ;;  %1209 = vmatpush3.bf16.msra.mxu1 %v1198_v13 }
  0x14   :  { %1091 = vmatmul.mubr.msk.f32.vlgmr.msra.gmra.mrb[0].mxu0 %vm216_vm0, %v145_v14  ;;  %1139 = vmatmul.mubr.msk.f32.vlgmr.msra.gmra.mrb[0].mxu1 %vm216_vm0, %v177_v15 }
  0x15   :  { %1093 = vmatprep.mubr.msk.f32.mxu0 %vm216_vm0, %v146_v16  ;;  %1141 = vmatprep.mubr.msk.f32.mxu1 %vm216_vm0, %v178_v17 }
  0x18   :  { %1094 = vmatmul.mubr.msk.f32.gmra.mrb[2].mxu0 %vm216_vm0, %v147_v18  ;;  %1142 = vmatmul.mubr.msk.f32.gmra.mrb[2].mxu1 %vm216_vm0, %v179_v19 }
  0x19   :  { %1096 = vmatprep.mubr.msk.f32.mxu0 %vm216_vm0, %v148_v20  ;;  %1144 = vmatprep.mubr.msk.f32.mxu1 %vm216_vm0, %v180_v21 }
  0x1a   :  { %7 = vsyncpa [#allocation3], 0  ;;  %v150_v24 = vld [vmem:[%s1548_s0 + $0x30] sm:$0xff]  ;;  %v151_v26 = vld [vmem:[%s1548_s0 + $0x38] sm:$0xff] }
  0x1b   :  { %v182_v25 = vld [vmem:[%s1548_s0 + $0x130] sm:$0xff]  ;;  %v183_v27 = vld [vmem:[%s1548_s0 + $0x138] sm:$0xff]  ;;  %v152_v28 = vld [vmem:[%s1548_s0 + $0x40] sm:$0xff] }
  0x1c   :  { %1097 = vmatmul.mubr.msk.f32.gmra.mrb[4].mxu0 %vm216_vm0, %v149_v22  ;;  %1145 = vmatmul.mubr.msk.f32.gmra.mrb[4].mxu1 %vm216_vm0, %v181_v23  ;;  %v184_v29 = vld [vmem:[%s1548_s0 + $0x140] sm:$0xff]  ;;  %v153_v30 = vld [vmem:[%s1548_s0 + $0x48] sm:$0xff]  ;;  %v154_v32 = vld [vmem:[%s1548_s0 + $0x50] sm:$0xff] }
  0x1d   :  { %1099 = vmatprep.mubr.msk.f32.mxu0 %vm216_vm0, %v150_v24  ;;  %1147 = vmatprep.mubr.msk.f32.mxu1 %vm216_vm0, %v182_v25  ;;  %v185_v31 = vld [vmem:[%s1548_s0 + $0x148] sm:$0xff]  ;;  %v186_v33 = vld [vmem:[%s1548_s0 + $0x150] sm:$0xff]  ;;  %v155_v34 = vld [vmem:[%s1548_s0 + $0x58] sm:$0xff] }
  0x1e   :  { %v187_v35 = vld [vmem:[%s1548_s0 + $0x158] sm:$0xff]  ;;  %v156_v36 = vld [vmem:[%s1548_s0 + $0x60] sm:$0xff]  ;;  %v157_v38 = vld [vmem:[%s1548_s0 + $0x68] sm:$0xff] }
  0x1f   :  { %v188_v37 = vld [vmem:[%s1548_s0 + $0x160] sm:$0xff]  ;;  %v189_v39 = vld [vmem:[%s1548_s0 + $0x168] sm:$0xff]  ;;  %v158_v40 = vld [vmem:[%s1548_s0 + $0x70] sm:$0xff] }
  0x20   :  { %1100 = vmatmul.mubr.msk.f32.gmra.mrb[6].mxu0 %vm216_vm0, %v151_v26  ;;  %1148 = vmatmul.mubr.msk.f32.gmra.mrb[6].mxu1 %vm216_vm0, %v183_v27  ;;  %v190_v41 = vld [vmem:[%s1548_s0 + $0x170] sm:$0xff]  ;;  %v159_v42 = vld [vmem:[%s1548_s0 + $0x78] sm:$0xff]  ;;  %v160_v44 = vld [vmem:[%s1548_s0 + $0x80] sm:$0xff] }
  0x21   :  { %1102 = vmatprep.mubr.msk.f32.mxu0 %vm216_vm0, %v152_v28  ;;  %1150 = vmatprep.mubr.msk.f32.mxu1 %vm216_vm0, %v184_v29  ;;  %v191_v43 = vld [vmem:[%s1548_s0 + $0x178] sm:$0xff]  ;;  %v192_v45 = vld [vmem:[%s1548_s0 + $0x180] sm:$0xff]  ;;  %v161_v46 = vld [vmem:[%s1548_s0 + $0x88] sm:$0xff] }
  0x22   :  { %v193_v47 = vld [vmem:[%s1548_s0 + $0x188] sm:$0xff]  ;;  %v162_v48 = vld [vmem:[%s1548_s0 + $0x90] sm:$0xff]  ;;  %v163_v50 = vld [vmem:[%s1548_s0 + $0x98] sm:$0xff] }
  0x23   :  { %v194_v49 = vld [vmem:[%s1548_s0 + $0x190] sm:$0xff]  ;;  %v195_v51 = vld [vmem:[%s1548_s0 + $0x198] sm:$0xff]  ;;  %v164_v52 = vld [vmem:[%s1548_s0 + $0xa0] sm:$0xff] }
  0x24   :  { %1103 = vmatmul.mubr.msk.f32.gmra.mrb[8].mxu0 %vm216_vm0, %v153_v30  ;;  %1151 = vmatmul.mubr.msk.f32.gmra.mrb[8].mxu1 %vm216_vm0, %v185_v31  ;;  %v196_v53 = vld [vmem:[%s1548_s0 + $0x1a0] sm:$0xff]  ;;  %v165_v54 = vld [vmem:[%s1548_s0 + $0xa8] sm:$0xff]  ;;  %v166_v56 = vld [vmem:[%s1548_s0 + $0xb0] sm:$0xff] }
  0x25   :  { %1105 = vmatprep.mubr.msk.f32.mxu0 %vm216_vm0, %v154_v32  ;;  %1153 = vmatprep.mubr.msk.f32.mxu1 %vm216_vm0, %v186_v33  ;;  %v197_v55 = vld [vmem:[%s1548_s0 + $0x1a8] sm:$0xff]  ;;  %v198_v57 = vld [vmem:[%s1548_s0 + $0x1b0] sm:$0xff]  ;;  %v167_v58 = vld [vmem:[%s1548_s0 + $0xb8] sm:$0xff] }
  0x26   :  { %v199_v59 = vld [vmem:[%s1548_s0 + $0x1b8] sm:$0xff]  ;;  %v168_v60 = vld [vmem:[%s1548_s0 + $0xc0] sm:$0xff]  ;;  %v169_v62 = vld [vmem:[%s1548_s0 + $0xc8] sm:$0xff] }
  0x27   :  { %v200_v61 = vld [vmem:[%s1548_s0 + $0x1c0] sm:$0xff]  ;;  %v201_v63 = vld [vmem:[%s1548_s0 + $0x1c8] sm:$0xff]  ;;  %v170_v0 = vld [vmem:[%s1548_s0 + $0xd0] sm:$0xff] }
  0x28   :  { %1106 = vmatmul.mubr.msk.f32.gmra.mrb[10].mxu0 %vm216_vm0, %v155_v34  ;;  %1154 = vmatmul.mubr.msk.f32.gmra.mrb[10].mxu1 %vm216_vm0, %v187_v35  ;;  %v202_v1 = vld [vmem:[%s1548_s0 + $0x1d0] sm:$0xff]  ;;  %v171_v2 = vld [vmem:[%s1548_s0 + $0xd8] sm:$0xff]  ;;  %v172_v4 = vld [vmem:[%s1548_s0 + $0xe0] sm:$0xff] }
  0x29   :  { %1108 = vmatprep.mubr.msk.f32.mxu0 %vm216_vm0, %v156_v36  ;;  %1156 = vmatprep.mubr.msk.f32.mxu1 %vm216_vm0, %v188_v37  ;;  %v203_v3 = vld [vmem:[%s1548_s0 + $0x1d8] sm:$0xff]  ;;  %v204_v5 = vld [vmem:[%s1548_s0 + $0x1e0] sm:$0xff]  ;;  %v173_v6 = vld [vmem:[%s1548_s0 + $0xe8] sm:$0xff] }
  0x2a   :  { %v205_v7 = vld [vmem:[%s1548_s0 + $0x1e8] sm:$0xff]  ;;  %v174_v8 = vld [vmem:[%s1548_s0 + $0xf0] sm:$0xff]  ;;  %v175_v10 = vld [vmem:[%s1548_s0 + $0xf8] sm:$0xff] }
  0x2b   :  { %v206_v9 = vld [vmem:[%s1548_s0 + $0x1f0] sm:$0xff]  ;;  %v207_v11 = vld [vmem:[%s1548_s0 + $0x1f8] sm:$0xff]  ;;  %s1238_s0 = smov [#allocation2]  }
  0x2c   :  { %1109 = vmatmul.mubr.msk.f32.gmra.mrb[12].mxu0 %vm216_vm0, %v157_v38  ;;  %1157 = vmatmul.mubr.msk.f32.gmra.mrb[12].mxu1 %vm216_vm0, %v189_v39  ;;  %s927_s8 = sshll.u32 %s1238_s0, 4  ;;  %s928_s8 = int_to_ptr.vmem [resolvable:$true] %s927_s8 }
  0x2d   :  { %1111 = vmatprep.mubr.msk.f32.mxu0 %vm216_vm0, %v158_v40  ;;  %1159 = vmatprep.mubr.msk.f32.mxu1 %vm216_vm0, %v190_v41  ;;  %s1214_s9 = scalar_lea.vmem %s928_s8, 8192  ;;  %p1219_p1 = scmp.lt.s32.totalorder %s928_s8, %s928_s8 }
  0x2e   :  { %p1215_p0 = scmp.ne.s32.totalorder %s928_s8, %s1214_s9  ;;  %p1220_p2 = scmp.lt.s32.totalorder %s1214_s9, %s1214_s9 }
  0x30   :  { %1112 = vmatmul.mubr.msk.f32.gmra.mrb[14].mxu0 %vm216_vm0, %v159_v42  ;;  %1160 = vmatmul.mubr.msk.f32.gmra.mrb[14].mxu1 %vm216_vm0, %v191_v43  ;;  %p1221_p3 = por %p1220_p2, %p1219_p1 }
  0x31   :  { %1114 = vmatprep.mubr.msk.f32.mxu0 %vm216_vm0, %v160_v44  ;;  %1162 = vmatprep.mubr.msk.f32.mxu1 %vm216_vm0, %v192_v45 }
  0x32   :  { %p1222_p4 = pnand %p1221_p3, %p1215_p0 }
  0x34   :  { %1115 = vmatmul.mubr.msk.f32.gmra.mrb[16].mxu0 %vm216_vm0, %v161_v46  ;;  %1163 = vmatmul.mubr.msk.f32.gmra.mrb[16].mxu1 %vm216_vm0, %v193_v47 }
  0x35   :  { %1117 = vmatprep.mubr.msk.f32.mxu0 %vm216_vm0, %v162_v48  ;;  %1165 = vmatprep.mubr.msk.f32.mxu1 %vm216_vm0, %v194_v49 }
  0x38   :  { %1118 = vmatmul.mubr.msk.f32.gmra.mrb[18].mxu0 %vm216_vm0, %v163_v50  ;;  %1166 = vmatmul.mubr.msk.f32.gmra.mrb[18].mxu1 %vm216_vm0, %v195_v51 }
  0x39   :  { %1120 = vmatprep.mubr.msk.f32.mxu0 %vm216_vm0, %v164_v52  ;;  %1168 = vmatprep.mubr.msk.f32.mxu1 %vm216_vm0, %v196_v53 }
  0x3c   :  { %1121 = vmatmul.mubr.msk.f32.gmra.mrb[20].mxu0 %vm216_vm0, %v165_v54  ;;  %1169 = vmatmul.mubr.msk.f32.gmra.mrb[20].mxu1 %vm216_vm0, %v197_v55 }
  0x3d   :  { %1123 = vmatprep.mubr.msk.f32.mxu0 %vm216_vm0, %v166_v56  ;;  %1171 = vmatprep.mubr.msk.f32.mxu1 %vm216_vm0, %v198_v57 }
  0x40   :  { %1124 = vmatmul.mubr.msk.f32.gmra.mrb[22].mxu0 %vm216_vm0, %v167_v58  ;;  %1172 = vmatmul.mubr.msk.f32.gmra.mrb[22].mxu1 %vm216_vm0, %v199_v59 }
  0x41   :  { %1126 = vmatprep.mubr.msk.f32.mxu0 %vm216_vm0, %v168_v60  ;;  %1174 = vmatprep.mubr.msk.f32.mxu1 %vm216_vm0, %v200_v61 }
  0x44   :  { %1127 = vmatmul.mubr.msk.f32.gmra.mrb[24].mxu0 %vm216_vm0, %v169_v62  ;;  %1175 = vmatmul.mubr.msk.f32.gmra.mrb[24].mxu1 %vm216_vm0, %v201_v63 }
  0x45   :  { %1129 = vmatprep.mubr.msk.f32.mxu0 %vm216_vm0, %v170_v0  ;;  %1177 = vmatprep.mubr.msk.f32.mxu1 %vm216_vm0, %v202_v1 }
  0x48   :  { %1130 = vmatmul.mubr.msk.f32.gmra.mrb[26].mxu0 %vm216_vm0, %v171_v2  ;;  %1178 = vmatmul.mubr.msk.f32.gmra.mrb[26].mxu1 %vm216_vm0, %v203_v3 }
  0x49   :  { %1132 = vmatprep.mubr.msk.f32.mxu0 %vm216_vm0, %v172_v4  ;;  %1180 = vmatprep.mubr.msk.f32.mxu1 %vm216_vm0, %v204_v5 }
  0x4c   :  { %1133 = vmatmul.mubr.msk.f32.gmra.mrb[28].mxu0 %vm216_vm0, %v173_v6  ;;  %1181 = vmatmul.mubr.msk.f32.gmra.mrb[28].mxu1 %vm216_vm0, %v205_v7 }
  0x4d   :  { %1135 = vmatprep.mubr.msk.f32.mxu0 %vm216_vm0, %v174_v8  ;;  %1183 = vmatprep.mubr.msk.f32.mxu1 %vm216_vm0, %v206_v9 }
  0x50   :  { %1136 = vmatmul.mubr.msk.f32.gmra.mrb[30].mxu0 %vm216_vm0, %v175_v10  ;;  %1184 = vmatmul.mubr.msk.f32.gmra.mrb[30].mxu1 %vm216_vm0, %v207_v11 }
  0xe7   :  { %v1092_v12 = vpop.f32.mrb[0].mxu0  ;;  %v1140_v13 = vpop.f32.mrb[0].mxu1 }
  0xe8   :  { %v475_v14 = vpop.f32.mrb[1].mxu0  ;;  %v635_v15 = vpop.f32.mrb[1].mxu1  ;;  %859 = vst [vmem:[#allocation2 + $0x8] sm:$0xff] %v1092_v12  ;;  %891 = vst [vmem:[#allocation2 + $0x108] sm:$0xff] %v1140_v13 }
  0xe9   :  { %858 = vst [vmem:[#allocation2] sm:$0xff] %v475_v14  ;;  %890 = vst [vmem:[#allocation2 + $0x100] sm:$0xff] %v635_v15 }
  0xeb   :  { %v1095_v16 = vpop.f32.mrb[2].mxu0  ;;  %v1143_v17 = vpop.f32.mrb[2].mxu1 }
  0xec   :  { %v485_v18 = vpop.f32.mrb[3].mxu0  ;;  %v645_v19 = vpop.f32.mrb[3].mxu1  ;;  %861 = vst [vmem:[#allocation2 + $0x18] sm:$0xff] %v1095_v16  ;;  %893 = vst [vmem:[#allocation2 + $0x118] sm:$0xff] %v1143_v17 }
  0xed   :  { %860 = vst [vmem:[#allocation2 + $0x10] sm:$0xff] %v485_v18  ;;  %892 = vst [vmem:[#allocation2 + $0x110] sm:$0xff] %v645_v19 }
  0xef   :  { %v1098_v20 = vpop.f32.mrb[4].mxu0  ;;  %v1146_v21 = vpop.f32.mrb[4].mxu1 }
  0xf0   :  { %v495_v22 = vpop.f32.mrb[5].mxu0  ;;  %v655_v23 = vpop.f32.mrb[5].mxu1  ;;  %863 = vst [vmem:[#allocation2 + $0x28] sm:$0xff] %v1098_v20  ;;  %895 = vst [vmem:[#allocation2 + $0x128] sm:$0xff] %v1146_v21 }
  0xf1   :  { %862 = vst [vmem:[#allocation2 + $0x20] sm:$0xff] %v495_v22  ;;  %894 = vst [vmem:[#allocation2 + $0x120] sm:$0xff] %v655_v23 }
  0xf3   :  { %v1101_v24 = vpop.f32.mrb[6].mxu0  ;;  %v1149_v25 = vpop.f32.mrb[6].mxu1 }
  0xf4   :  { %v505_v26 = vpop.f32.mrb[7].mxu0  ;;  %v665_v27 = vpop.f32.mrb[7].mxu1  ;;  %865 = vst [vmem:[#allocation2 + $0x38] sm:$0xff] %v1101_v24  ;;  %897 = vst [vmem:[#allocation2 + $0x138] sm:$0xff] %v1149_v25 }
  0xf5   :  { %864 = vst [vmem:[#allocation2 + $0x30] sm:$0xff] %v505_v26  ;;  %896 = vst [vmem:[#allocation2 + $0x130] sm:$0xff] %v665_v27 }
  0xf7   :  { %v1104_v28 = vpop.f32.mrb[8].mxu0  ;;  %v1152_v29 = vpop.f32.mrb[8].mxu1 }
  0xf8   :  { %v515_v30 = vpop.f32.mrb[9].mxu0  ;;  %v675_v31 = vpop.f32.mrb[9].mxu1  ;;  %867 = vst [vmem:[#allocation2 + $0x48] sm:$0xff] %v1104_v28  ;;  %899 = vst [vmem:[#allocation2 + $0x148] sm:$0xff] %v1152_v29 }
  0xf9   :  { %866 = vst [vmem:[#allocation2 + $0x40] sm:$0xff] %v515_v30  ;;  %898 = vst [vmem:[#allocation2 + $0x140] sm:$0xff] %v675_v31 }
  0xfb   :  { %v1107_v32 = vpop.f32.mrb[10].mxu0  ;;  %v1155_v33 = vpop.f32.mrb[10].mxu1 }
  0xfc   :  { %v525_v34 = vpop.f32.mrb[11].mxu0  ;;  %v685_v35 = vpop.f32.mrb[11].mxu1  ;;  %869 = vst [vmem:[#allocation2 + $0x58] sm:$0xff] %v1107_v32  ;;  %901 = vst [vmem:[#allocation2 + $0x158] sm:$0xff] %v1155_v33 }
  0xfd   :  { %868 = vst [vmem:[#allocation2 + $0x50] sm:$0xff] %v525_v34  ;;  %900 = vst [vmem:[#allocation2 + $0x150] sm:$0xff] %v685_v35 }
  0xff   :  { %v1110_v36 = vpop.f32.mrb[12].mxu0  ;;  %v1158_v37 = vpop.f32.mrb[12].mxu1 }
 0x100   :  { %v535_v38 = vpop.f32.mrb[13].mxu0  ;;  %v695_v39 = vpop.f32.mrb[13].mxu1  ;;  %871 = vst [vmem:[#allocation2 + $0x68] sm:$0xff] %v1110_v36  ;;  %903 = vst [vmem:[#allocation2 + $0x168] sm:$0xff] %v1158_v37 }
 0x101   :  { %870 = vst [vmem:[#allocation2 + $0x60] sm:$0xff] %v535_v38  ;;  %902 = vst [vmem:[#allocation2 + $0x160] sm:$0xff] %v695_v39 }
 0x103   :  { %v1113_v40 = vpop.f32.mrb[14].mxu0  ;;  %v1161_v41 = vpop.f32.mrb[14].mxu1 }
 0x104   :  { %v545_v42 = vpop.f32.mrb[15].mxu0  ;;  %v705_v43 = vpop.f32.mrb[15].mxu1  ;;  %873 = vst [vmem:[#allocation2 + $0x78] sm:$0xff] %v1113_v40  ;;  %905 = vst [vmem:[#allocation2 + $0x178] sm:$0xff] %v1161_v41 }
 0x105   :  { %872 = vst [vmem:[#allocation2 + $0x70] sm:$0xff] %v545_v42  ;;  %904 = vst [vmem:[#allocation2 + $0x170] sm:$0xff] %v705_v43 }
 0x107   :  { %v1116_v44 = vpop.f32.mrb[16].mxu0  ;;  %v1164_v45 = vpop.f32.mrb[16].mxu1 }
 0x108   :  { %v555_v46 = vpop.f32.mrb[17].mxu0  ;;  %v715_v47 = vpop.f32.mrb[17].mxu1  ;;  %875 = vst [vmem:[#allocation2 + $0x88] sm:$0xff] %v1116_v44  ;;  %907 = vst [vmem:[#allocation2 + $0x188] sm:$0xff] %v1164_v45 }
 0x109   :  { %874 = vst [vmem:[#allocation2 + $0x80] sm:$0xff] %v555_v46  ;;  %906 = vst [vmem:[#allocation2 + $0x180] sm:$0xff] %v715_v47 }
 0x10b   :  { %v1119_v48 = vpop.f32.mrb[18].mxu0  ;;  %v1167_v49 = vpop.f32.mrb[18].mxu1 }
 0x10c   :  { %v565_v50 = vpop.f32.mrb[19].mxu0  ;;  %v725_v51 = vpop.f32.mrb[19].mxu1  ;;  %877 = vst [vmem:[#allocation2 + $0x98] sm:$0xff] %v1119_v48  ;;  %909 = vst [vmem:[#allocation2 + $0x198] sm:$0xff] %v1167_v49 }
 0x10d   :  { %876 = vst [vmem:[#allocation2 + $0x90] sm:$0xff] %v565_v50  ;;  %908 = vst [vmem:[#allocation2 + $0x190] sm:$0xff] %v725_v51 }
 0x10f   :  { %v1122_v52 = vpop.f32.mrb[20].mxu0  ;;  %v1170_v53 = vpop.f32.mrb[20].mxu1 }
 0x110   :  { %v575_v54 = vpop.f32.mrb[21].mxu0  ;;  %v735_v55 = vpop.f32.mrb[21].mxu1  ;;  %879 = vst [vmem:[#allocation2 + $0xa8] sm:$0xff] %v1122_v52  ;;  %911 = vst [vmem:[#allocation2 + $0x1a8] sm:$0xff] %v1170_v53 }
 0x111   :  { %878 = vst [vmem:[#allocation2 + $0xa0] sm:$0xff] %v575_v54  ;;  %910 = vst [vmem:[#allocation2 + $0x1a0] sm:$0xff] %v735_v55 }
 0x113   :  { %v1125_v56 = vpop.f32.mrb[22].mxu0  ;;  %v1173_v57 = vpop.f32.mrb[22].mxu1 }
 0x114   :  { %v585_v58 = vpop.f32.mrb[23].mxu0  ;;  %v745_v59 = vpop.f32.mrb[23].mxu1  ;;  %881 = vst [vmem:[#allocation2 + $0xb8] sm:$0xff] %v1125_v56  ;;  %913 = vst [vmem:[#allocation2 + $0x1b8] sm:$0xff] %v1173_v57 }
 0x115   :  { %880 = vst [vmem:[#allocation2 + $0xb0] sm:$0xff] %v585_v58  ;;  %912 = vst [vmem:[#allocation2 + $0x1b0] sm:$0xff] %v745_v59 }
 0x117   :  { %v1128_v60 = vpop.f32.mrb[24].mxu0  ;;  %v1176_v61 = vpop.f32.mrb[24].mxu1 }
 0x118   :  { %v595_v62 = vpop.f32.mrb[25].mxu0  ;;  %v755_v63 = vpop.f32.mrb[25].mxu1  ;;  %883 = vst [vmem:[#allocation2 + $0xc8] sm:$0xff] %v1128_v60  ;;  %915 = vst [vmem:[#allocation2 + $0x1c8] sm:$0xff] %v1176_v61 }
 0x119   :  { %882 = vst [vmem:[#allocation2 + $0xc0] sm:$0xff] %v595_v62  ;;  %914 = vst [vmem:[#allocation2 + $0x1c0] sm:$0xff] %v755_v63 }
 0x11b   :  { %v1131_v0 = vpop.f32.mrb[26].mxu0  ;;  %v1179_v1 = vpop.f32.mrb[26].mxu1 }
 0x11c   :  { %v605_v2 = vpop.f32.mrb[27].mxu0  ;;  %v765_v3 = vpop.f32.mrb[27].mxu1  ;;  %885 = vst [vmem:[#allocation2 + $0xd8] sm:$0xff] %v1131_v0  ;;  %917 = vst [vmem:[#allocation2 + $0x1d8] sm:$0xff] %v1179_v1 }
 0x11d   :  { %884 = vst [vmem:[#allocation2 + $0xd0] sm:$0xff] %v605_v2  ;;  %916 = vst [vmem:[#allocation2 + $0x1d0] sm:$0xff] %v765_v3 }
 0x11f   :  { %v1134_v4 = vpop.f32.mrb[28].mxu0  ;;  %v1182_v5 = vpop.f32.mrb[28].mxu1 }
 0x120   :  { %v615_v6 = vpop.f32.mrb[29].mxu0  ;;  %v775_v7 = vpop.f32.mrb[29].mxu1  ;;  %887 = vst [vmem:[#allocation2 + $0xe8] sm:$0xff] %v1134_v4  ;;  %919 = vst [vmem:[#allocation2 + $0x1e8] sm:$0xff] %v1182_v5 }
 0x121   :  { %886 = vst [vmem:[#allocation2 + $0xe0] sm:$0xff] %v615_v6  ;;  %918 = vst [vmem:[#allocation2 + $0x1e0] sm:$0xff] %v775_v7 }
 0x123   :  { %v1137_v8 = vpop.f32.mrb[30].mxu0  ;;  %v1185_v9 = vpop.f32.mrb[30].mxu1 }
 0x124   :  { %v625_v10 = vpop.f32.mrb[31].mxu0  ;;  %v785_v11 = vpop.f32.mrb[31].mxu1  ;;  %889 = vst [vmem:[#allocation2 + $0xf8] sm:$0xff] %v1137_v8  ;;  %921 = vst [vmem:[#allocation2 + $0x1f8] sm:$0xff] %v1185_v9 }
 0x125   :  { %888 = vst [vmem:[#allocation2 + $0xf0] sm:$0xff] %v625_v10  ;;  %920 = vst [vmem:[#allocation2 + $0x1f0] sm:$0xff] %v785_v11 }
 0x126   :  { %1225 = shalt.err (!%p1222_p4)
}
 0x127   :  { %s1226_s12 = scalar_lea.hbm %s1550_s2, 8192 }
 0x128   :  { %p1227_p5 = scmp.ne.s32.totalorder %s1550_s2, %s1226_s12  ;;  %p1230_p6 = scmp.lt.u32.totalorder %s1226_s12, %s1550_s2 }
 0x12a   :  { %p1232_p7 = pnand %p1230_p6, %p1227_p5 }
 0x12c   :  { %1235 = shalt.err (!%p1232_p7)
}
 0x12d   :  { %s1239_s17 = smov 128   ;;  %s1240_s18 = smov 8  }
 0x12e   :  { %933 = dma.vmem_to_hbm [thread:$0]  %s928_s8, 8192, %s1550_s2, [#allocation3], %s1239_s17, %s1239_s17, %s1240_s18  }
 0x12f   :  { %1236 = dma.done.wait [#allocation3], 8192  }
 0x130   :  { %1237 = vsyncadd [#allocation3], 4294959104 }
 0x131   :  { %937 = vsyncpa [#allocation3], 1 }

</bundles_post_ra>
